<compile_context>
chip_gen: v5e
topology: v5e:2x2
jax: 0.10.0
libtpu: 0.0.40
codegen_flags: <defaults>
</compile_context>

<pallas_src>
import jax
import jax.numpy as jnp
from jax import lax
from jax.experimental import pallas as pl
from jax.experimental.pallas import tpu as pltpu


def _round_up(x, m):
    return ((x + m - 1) // m) * m


def _col_to_row(col):
    """(n, 1) column -> (1, n) lane-dense row using one-hot select + sublane
    reduce (broadcast/iota/where/sum only — guaranteed to lower in Mosaic)."""
    n = col.shape[0]
    ii = lax.broadcasted_iota(jnp.int32, (n, n), 0)
    jj = lax.broadcasted_iota(jnp.int32, (n, n), 1)
    return jnp.sum(jnp.where(ii == jj, col, jnp.float32(0.0)),
                   axis=0, keepdims=True)


def open_proto_kernel(max_prob_ref, feat_ref, proto_ref, wf_ref, pslab_ref, out_ref):
    tb = feat_ref.shape[0]

    # --- fused projection: stack feat/proto in VMEM (tiny copy), cast to bf16,
    #     ONE (2*tb, F) @ (F, H) MXU matmul with f32 accumulation ------------
    x2 = jnp.concatenate([feat_ref[...], proto_ref[...]], axis=0)       # (2*tb, F) f32
    proj = jnp.dot(x2.astype(jnp.bfloat16), wf_ref[...],
                   preferred_element_type=jnp.float32)                  # (2*tb, H) f32

    slab = pslab_ref[...]                                               # (6, H) f32
    bf     = slab[0:1, :]          # feat_proj bias               (1, H)
    w1_mp  = slab[1:2, :]          # classifier W1 row for max_prob
    w1_sim = slab[2:3, :]          # classifier W1 row for sim
    b1     = slab[3:4, :]          # classifier b1                (1, H)
    w2_row = slab[4:5, :]          # classifier W2^T              (1, H)
    b2     = slab[5:6, 0:1]        # classifier b2                (1, 1)

    fp = proj[0:tb, :] + bf                                             # (tb, H)
    pp = proj[tb:2 * tb, :] + bf                                        # (tb, H)

    # --- cosine similarity along hidden dim (ATen semantics, eps = 1e-8) ----
    eps = jnp.float32(1e-8)
    dot = jnp.sum(fp * pp, axis=-1, keepdims=True)                      # (tb, 1)
    nf2 = jnp.sum(fp * fp, axis=-1, keepdims=True)                      # (tb, 1)
    np2 = jnp.sum(pp * pp, axis=-1, keepdims=True)                      # (tb, 1)
    # dot * rsqrt(clamp_min(||a||^2*||b||^2, eps^2))  (rsqrt -> EUP slot)
    sim = dot * lax.rsqrt(jnp.maximum(nf2 * np2, eps * eps))            # (tb, 1)

    # --- classifier: Linear(2->H) as rank-1 VPU updates, ReLU, Linear(H->1) --
    mp = max_prob_ref[...]                                              # (tb, 1)
    h = jnp.maximum(mp * w1_mp + sim * w1_sim + b1, 0.0)                # (tb, H)
    out_col = jnp.sum(h * w2_row, axis=-1, keepdims=True) + b2          # (tb, 1)

    # Lane-dense store: (tb, 1) -> (1, tb).
    out_ref[...] = _col_to_row(out_col)


def pack_params(params):
    """One-time packing: bf16 projection weight + a single (6, H) f32 param slab."""
    wf, bf, w1, b1, w2, b2 = params
    H = wf.shape[1]
    b2_row = jnp.zeros((1, H), jnp.float32).at[0, 0].set(b2[0, 0])
    pslab = jnp.concatenate([bf, w1, b1, w2.T, b2_row], axis=0).astype(jnp.float32)
    return wf.astype(jnp.bfloat16), pslab              # (F, H) bf16, (6, H) f32


@jax.jit
def open_proto_detector(max_prob, feat, proto, wf_bf16, pslab):
    """Returns shape (B,) float32 (matches .squeeze(1) in PyTorch)."""
    B, F = feat.shape
    H = wf_bf16.shape[1]

    # Batch tile: multiple of 8 (f32 sublanes) so the fused [feat; proto] split
    # stays on a vreg sublane boundary; capped at 256 rows so the double-
    # buffered pipeline fits easily in v7x's 64 MiB VMEM on the large-B path.
    if B <= 256:
        tile_b = _round_up(B, 8)
    else:
        tile_b = 256
    Bp = _round_up(B, tile_b)

    if Bp != B:
        pad = Bp - B
        max_prob = jnp.pad(max_prob, ((0, pad), (0, 0)))
        feat = jnp.pad(feat, ((0, pad), (0, 0)))
        proto = jnp.pad(proto, ((0, pad), (0, 0)))

    grid = (Bp // tile_b,)

    out = pl.pallas_call(
        open_proto_kernel,
        out_shape=jax.ShapeDtypeStruct((1, Bp), jnp.float32),
        grid_spec=pltpu.PrefetchScalarGridSpec(
            num_scalar_prefetch=0,
            grid=grid,
            in_specs=[
                pl.BlockSpec((tile_b, 1), lambda i: (i, 0)),   # max_prob
                pl.BlockSpec((tile_b, F), lambda i: (i, 0)),   # feat
                pl.BlockSpec((tile_b, F), lambda i: (i, 0)),   # proto
                pl.BlockSpec((F, H), lambda i: (0, 0)),        # wf (resident)
                pl.BlockSpec((6, H), lambda i: (0, 0)),        # param slab (resident)
            ],
            out_specs=pl.BlockSpec((1, tile_b), lambda i: (0, i)),
        ),
        compiler_params=pltpu.CompilerParams(
            dimension_semantics=("parallel",)),
    )(max_prob, feat, proto, wf_bf16, pslab)

    return out[0, :B]


def init_params(key, feature_dim, hidden_dim):
    """Deterministic synthetic parameters (PyTorch-style uniform fan-in init)."""
    ks = jax.random.split(key, 6)

    def lin(kw, kb, fan_in, fan_out):
        bound = 1.0 / jnp.sqrt(jnp.float32(fan_in))
        w = jax.random.uniform(kw, (fan_in, fan_out), jnp.float32, -bound, bound)
        b = jax.random.uniform(kb, (1, fan_out), jnp.float32, -bound, bound)
        return w, b

    wf, bf = lin(ks[0], ks[1], feature_dim, hidden_dim)   # feat_proj (transposed)
    w1, b1 = lin(ks[2], ks[3], 2, hidden_dim)             # classifier[0] (transposed)
    w2, b2 = lin(ks[4], ks[5], hidden_dim, 1)             # classifier[2] (transposed)
    return wf, bf, w1, b1, w2, b2


def reference_forward_f32(max_prob, feat, proto, params):
    """Pure-JAX f32 reference of the PyTorch forward."""
    wf, bf, w1, b1, w2, b2 = params
    fp = feat @ wf + bf
    pp = proto @ wf + bf
    eps = 1e-8
    dot = jnp.sum(fp * pp, axis=1, keepdims=True)
    denom = jnp.sqrt(jnp.maximum(jnp.sum(fp * fp, 1, keepdims=True)
                                 * jnp.sum(pp * pp, 1, keepdims=True), eps * eps))
    sim = dot / denom
    x = jnp.concatenate([max_prob, sim], axis=1)
    h = jnp.maximum(x @ w1 + b1, 0.0)
    return (h @ w2 + b2)[:, 0]


def reference_forward_bf16(max_prob, feat, proto, params):
    """Reference mirroring the kernel's precision (bf16 matmul operands, f32 acc)."""
    wf, bf, w1, b1, w2, b2 = params
    x2 = jnp.concatenate([feat, proto], axis=0).astype(jnp.bfloat16)
    proj = jnp.dot(x2, wf.astype(jnp.bfloat16), preferred_element_type=jnp.float32)
    B = feat.shape[0]
    fp = proj[:B] + bf
    pp = proj[B:] + bf
    eps = jnp.float32(1e-8)
    dot = jnp.sum(fp * pp, axis=1, keepdims=True)
    nf2 = jnp.sum(fp * fp, axis=1, keepdims=True)
    np2 = jnp.sum(pp * pp, axis=1, keepdims=True)
    sim = dot * lax.rsqrt(jnp.maximum(nf2 * np2, eps * eps))
    h = jnp.maximum(max_prob * w1[0:1, :] + sim * w1[1:2, :] + b1, 0.0)
    return (jnp.sum(h * w2.T, axis=1, keepdims=True) + b2[0, 0])[:, 0]


if __name__ == "__main__":
    B, FEATURE_DIM, HIDDEN_DIM = 8, 256, 128

    key = jax.random.PRNGKey(0)
    k_mp, k_feat, k_proto, k_params = jax.random.split(key, 4)

    max_prob = jax.random.uniform(k_mp, (B, 1), jnp.float32)
    feat = jax.random.normal(k_feat, (B, FEATURE_DIM), jnp.float32)
    proto = jax.random.normal(k_proto, (B, FEATURE_DIM), jnp.float32)
    params = init_params(k_params, FEATURE_DIM, HIDDEN_DIM)
    wf_bf16, pslab = pack_params(params)

    out = open_proto_detector(max_prob, feat, proto, wf_bf16, pslab)
    out = jax.block_until_ready(out)
    assert out.shape == (B,)

    # Tight check vs. a reference mirroring the kernel's bf16-matmul precision.
    ref_bf16 = reference_forward_bf16(max_prob, feat, proto, params)
    assert jnp.allclose(out, ref_bf16, atol=2e-3, rtol=2e-3), (out, ref_bf16)

    # Loose check vs. full-f32 PyTorch-semantics reference (bf16 operand rounding).
    ref_f32 = reference_forward_f32(max_prob, feat, proto, params)
    assert jnp.allclose(out, ref_f32, atol=5e-2, rtol=5e-2), (out, ref_f32)

    print("KERNEL_OK")
</pallas_src>

<mosaic_0001>
module attributes {stable_mosaic.version = 11 : i64} {
  func.func @open_proto_kernel(%arg0: i32, %arg1: memref<8x1xf32, #tpu.memory_space<vmem>>, %arg2: memref<8x256xf32, #tpu.memory_space<vmem>>, %arg3: memref<8x256xf32, #tpu.memory_space<vmem>>, %arg4: memref<256x128xbf16, #tpu.memory_space<vmem>>, %arg5: memref<6x128xf32, #tpu.memory_space<vmem>>, %arg6: memref<1x8xf32, #tpu.memory_space<vmem>>) attributes {dimension_semantics = [#tpu.dimension_semantics<parallel>], iteration_bounds = array<i64: 1>, scalar_prefetch = 0 : i64, scratch_operands = 0 : i64, tpu.core_type = #tpu.core_type<tc>, window_params = [{transform_indices = @transform_0, window_bounds = array<i64: 8, 1>}, {transform_indices = @transform_1, window_bounds = array<i64: 8, 256>}, {transform_indices = @transform_2, window_bounds = array<i64: 8, 256>}, {pipeline_mode = #tpu.pipeline_mode<synchronous>, transform_indices = @transform_3, window_bounds = array<i64: 256, 128>}, {pipeline_mode = #tpu.pipeline_mode<synchronous>, transform_indices = @transform_4, window_bounds = array<i64: 6, 128>}, {transform_indices = @transform_5, window_bounds = array<i64: 1, 8>}]} {
    %c0 = arith.constant 0 : index
    %c0_0 = arith.constant 0 : index
    %0 = vector.load %arg2[%c0, %c0_0] : memref<8x256xf32, #tpu.memory_space<vmem>>, vector<8x256xf32>
    %c0_1 = arith.constant 0 : index
    %c0_2 = arith.constant 0 : index
    %1 = vector.load %arg3[%c0_1, %c0_2] : memref<8x256xf32, #tpu.memory_space<vmem>>, vector<8x256xf32>
    %2 = tpu.concatenate %0, %1 in 0 : vector<8x256xf32>, vector<8x256xf32> -> vector<16x256xf32>
    %3 = arith.truncf %2 : vector<16x256xf32> to vector<16x256xbf16>
    %c0_3 = arith.constant 0 : index
    %c0_4 = arith.constant 0 : index
    %4 = vector.load %arg4[%c0_3, %c0_4] : memref<256x128xbf16, #tpu.memory_space<vmem>>, vector<256x128xbf16>
    %cst = arith.constant dense<0.000000e+00> : vector<16x128xf32>
    %5 = tpu.matmul %3, %4, %cst {dimension_numbers = #tpu.dot_dimension_numbers<[1], [0], [0], [1], [0, 0, 1, 1], [], []>} : vector<16x256xbf16>, vector<256x128xbf16>, vector<16x128xf32> -> vector<16x128xf32>
    %c0_5 = arith.constant 0 : index
    %c0_6 = arith.constant 0 : index
    %6 = vector.load %arg5[%c0_5, %c0_6] : memref<6x128xf32, #tpu.memory_space<vmem>>, vector<6x128xf32>
    %7 = vector.extract_strided_slice %6 {offsets = [0, 0], sizes = [1, 128], strides = [1, 1]} : vector<6x128xf32> to vector<1x128xf32>
    %8 = vector.extract_strided_slice %6 {offsets = [1, 0], sizes = [1, 128], strides = [1, 1]} : vector<6x128xf32> to vector<1x128xf32>
    %9 = vector.extract_strided_slice %6 {offsets = [2, 0], sizes = [1, 128], strides = [1, 1]} : vector<6x128xf32> to vector<1x128xf32>
    %10 = vector.extract_strided_slice %6 {offsets = [3, 0], sizes = [1, 128], strides = [1, 1]} : vector<6x128xf32> to vector<1x128xf32>
    %11 = vector.extract_strided_slice %6 {offsets = [4, 0], sizes = [1, 128], strides = [1, 1]} : vector<6x128xf32> to vector<1x128xf32>
    %12 = vector.extract_strided_slice %6 {offsets = [5, 0], sizes = [1, 1], strides = [1, 1]} : vector<6x128xf32> to vector<1x1xf32>
    %13 = vector.extract_strided_slice %5 {offsets = [0, 0], sizes = [8, 128], strides = [1, 1]} : vector<16x128xf32> to vector<8x128xf32>
    %14 = vector.broadcast %7 : vector<1x128xf32> to vector<8x128xf32>
    %15 = arith.addf %13, %14 : vector<8x128xf32>
    %16 = vector.extract_strided_slice %5 {offsets = [8, 0], sizes = [8, 128], strides = [1, 1]} : vector<16x128xf32> to vector<8x128xf32>
    %17 = vector.broadcast %7 : vector<1x128xf32> to vector<8x128xf32>
    %18 = arith.addf %16, %17 : vector<8x128xf32>
    %19 = arith.mulf %15, %18 : vector<8x128xf32>
    %cst_7 = arith.constant dense<0.000000e+00> : vector<8xf32>
    %20 = vector.multi_reduction <add>, %19, %cst_7 [1] : vector<8x128xf32> to vector<8xf32>
    %21 = vector.shape_cast %20 : vector<8xf32> to vector<8x1xf32>
    %22 = arith.mulf %15, %15 : vector<8x128xf32>
    %cst_8 = arith.constant dense<0.000000e+00> : vector<8xf32>
    %23 = vector.multi_reduction <add>, %22, %cst_8 [1] : vector<8x128xf32> to vector<8xf32>
    %24 = vector.shape_cast %23 : vector<8xf32> to vector<8x1xf32>
    %25 = arith.mulf %18, %18 : vector<8x128xf32>
    %cst_9 = arith.constant dense<0.000000e+00> : vector<8xf32>
    %26 = vector.multi_reduction <add>, %25, %cst_9 [1] : vector<8x128xf32> to vector<8xf32>
    %27 = vector.shape_cast %26 : vector<8xf32> to vector<8x1xf32>
    %28 = arith.mulf %24, %27 : vector<8x1xf32>
    %cst_10 = arith.constant 9.99999993E-9 : f32
    %cst_11 = arith.constant 9.99999993E-9 : f32
    %29 = arith.mulf %cst_10, %cst_11 : f32
    %30 = vector.broadcast %29 : f32 to vector<8x1xf32>
    %31 = arith.maximumf %28, %30 : vector<8x1xf32>
    %32 = math.rsqrt %31 : vector<8x1xf32>
    %33 = arith.mulf %21, %32 : vector<8x1xf32>
    %c0_12 = arith.constant 0 : index
    %c0_13 = arith.constant 0 : index
    %34 = vector.load %arg1[%c0_12, %c0_13] : memref<8x1xf32, #tpu.memory_space<vmem>>, vector<8x1xf32>
    %35 = vector.broadcast %34 : vector<8x1xf32> to vector<8x128xf32>
    %36 = vector.broadcast %8 : vector<1x128xf32> to vector<8x128xf32>
    %37 = arith.mulf %35, %36 : vector<8x128xf32>
    %38 = vector.broadcast %33 : vector<8x1xf32> to vector<8x128xf32>
    %39 = vector.broadcast %9 : vector<1x128xf32> to vector<8x128xf32>
    %40 = arith.mulf %38, %39 : vector<8x128xf32>
    %41 = arith.addf %37, %40 : vector<8x128xf32>
    %42 = vector.broadcast %10 : vector<1x128xf32> to vector<8x128xf32>
    %43 = arith.addf %41, %42 : vector<8x128xf32>
    %cst_14 = arith.constant 0.000000e+00 : f32
    %44 = vector.broadcast %cst_14 : f32 to vector<8x128xf32>
    %45 = arith.maximumf %43, %44 : vector<8x128xf32>
    %46 = vector.broadcast %11 : vector<1x128xf32> to vector<8x128xf32>
    %47 = arith.mulf %45, %46 : vector<8x128xf32>
    %cst_15 = arith.constant dense<0.000000e+00> : vector<8xf32>
    %48 = vector.multi_reduction <add>, %47, %cst_15 [1] : vector<8x128xf32> to vector<8xf32>
    %49 = vector.shape_cast %48 : vector<8xf32> to vector<8x1xf32>
    %50 = vector.broadcast %12 : vector<1x1xf32> to vector<8x1xf32>
    %51 = arith.addf %49, %50 : vector<8x1xf32>
    %52 = tpu.iota {dimensions = array<i32: 0>} : vector<8x8xi32>
    %53 = tpu.iota {dimensions = array<i32: 1>} : vector<8x8xi32>
    %54 = arith.cmpi eq, %52, %53 : vector<8x8xi32>
    %cst_16 = arith.constant 0.000000e+00 : f32
    %55 = vector.shape_cast %51 : vector<8x1xf32> to vector<8x1xf32>
    %56 = vector.broadcast %55 : vector<8x1xf32> to vector<8x8xf32>
    %57 = vector.broadcast %cst_16 : f32 to vector<8x8xf32>
    %58 = arith.select %54, %56, %57 : vector<8x8xi1>, vector<8x8xf32>
    %cst_17 = arith.constant dense<0.000000e+00> : vector<8xf32>
    %59 = vector.multi_reduction <add>, %58, %cst_17 [0] : vector<8x8xf32> to vector<8xf32>
    %60 = vector.shape_cast %59 : vector<8xf32> to vector<1x8xf32>
    %c0_18 = arith.constant 0 : index
    %c0_19 = arith.constant 0 : index
    %61 = vector.load %arg6[%c0_18, %c0_19] : memref<1x8xf32, #tpu.memory_space<vmem>>, vector<1x8xf32>
    tpu.vector_store %arg6[%c0_18, %c0_19], %60 {strides = array<i32>} : memref<1x8xf32, #tpu.memory_space<vmem>>, vector<1x8xf32>,
    return
  }
  func.func @transform_0(%arg0: i32) -> (i32, i32) {
    %c0_i32 = arith.constant 0 : i32
    %c0_i32_0 = arith.constant 0 : i32
    return %arg0, %c0_i32 : i32, i32
  }
  func.func @transform_1(%arg0: i32) -> (i32, i32) {
    %c0_i32 = arith.constant 0 : i32
    %c0_i32_0 = arith.constant 0 : i32
    return %arg0, %c0_i32 : i32, i32
  }
  func.func @transform_2(%arg0: i32) -> (i32, i32) {
    %c0_i32 = arith.constant 0 : i32
    %c0_i32_0 = arith.constant 0 : i32
    return %arg0, %c0_i32 : i32, i32
  }
  func.func @transform_3(%arg0: i32) -> (i32, i32) {
    %c0_i32 = arith.constant 0 : i32
    %c0_i32_0 = arith.constant 0 : i32
    %c0_i32_1 = arith.constant 0 : i32
    return %c0_i32, %c0_i32_0 : i32, i32
  }
  func.func @transform_4(%arg0: i32) -> (i32, i32) {
    %c0_i32 = arith.constant 0 : i32
    %c0_i32_0 = arith.constant 0 : i32
    %c0_i32_1 = arith.constant 0 : i32
    return %c0_i32, %c0_i32_0 : i32, i32
  }
  func.func @transform_5(%arg0: i32) -> (i32, i32) {
    %c0_i32 = arith.constant 0 : i32
    %c0_i32_0 = arith.constant 0 : i32
    return %c0_i32, %arg0 : i32, i32
  }
}

</mosaic_0001>

<bundles_post_ra>
// kernel: open_proto_detector.1
= control target key start
LH: loop header
LB: loop body
LE: loop exit
PB: predicated region body
PF: predicated region fallthrough
CT: control target
= control target key end

     0   :  { %10 = vsyncpa [#allocation3], 0  ;;  %s560_s0 = inlined_call_operand.vmem [shape: f32[8,1], index: 0, kind: input, shape index: {}]   ;;  %s561_s1 = inlined_call_operand.hbm [shape: f32[8,256], index: 1, kind: input, shape index: {}]   ;;  %s562_s2 = inlined_call_operand.hbm [shape: f32[8,256], index: 2, kind: input, shape index: {}]   ;;  %s563_s3 = inlined_call_operand.hbm [shape: bf16[256,128], index: 3, kind: input, shape index: {}]   ;;  %s564_s4 = inlined_call_operand.vmem [shape: f32[6,128], index: 4, kind: input, shape index: {}]   ;;  %s565_s5 = inlined_call_operand.hbm [shape: f32[1,8], index: 5, kind: output, shape index: {}]  }
   0x1   :  { %11 = vsyncpa [#allocation6], 0  ;;  %s31_s20 = sshll.u32 %s562_s2, 4  ;;  %s32_s20 = int_to_ptr.hbm [resolvable:$true] %s31_s20 }
   0x2   :  { %12 = vsyncpa [#allocation4], 0  ;;  %s505_s21 = smov [#allocation5]   ;;  %s20_s25 = sshll.u32 %s561_s1, 4  ;;  %s21_s25 = int_to_ptr.hbm [resolvable:$true] %s20_s25 }
   0x3   :  { %s33_s22 = sshll.u32 %s505_s21, 4  ;;  %s506_s26 = smov [#allocation2]   ;;  %s34_s22 = int_to_ptr.vmem [resolvable:$true] %s33_s22 }
   0x4   :  { %36 = dma.hbm_to_vmem [thread:$0]  %s32_s20, 256, %s34_s22, [#allocation6]  }
   0x5   :  { %s22_s27 = sshll.u32 %s506_s26, 4  ;;  %s41_s30 = sshll.u32 %s563_s3, 4  ;;  %s23_s27 = int_to_ptr.vmem [resolvable:$true] %s22_s27  ;;  %s42_s30 = int_to_ptr.hbm [resolvable:$true] %s41_s30 }
   0x6   :  { %25 = dma.hbm_to_vmem [thread:$0]  %s21_s25, 256, %s23_s27, [#allocation3]  }
   0x7   :  { %s507_s2 = smov [#allocation7]   ;;  %s508_s7 = smov 64  }
   0x8   :  { %s43_s6 = sshll.u32 %s507_s2, 4  ;;  %s509_s8 = smov 4   ;;  %s44_s6 = int_to_ptr.vmem [resolvable:$true] %s43_s6 }
   0x9   :  { %49 = dma.hbm_to_vmem [thread:$0]  %s42_s30, 2048, %s44_s6, [#allocation6], %s508_s7, %s508_s7, %s509_s8  }
   0xa   :  { %499 = dma.done.wait [#allocation3], 256  }
   0xb   :  { %500 = vsyncadd [#allocation3], 4294967040 }
   0xc   :  { %501 = dma.done.wait [#allocation6], 2304  }
   0xd   :  { %502 = vsyncadd [#allocation6], 4294964992  ;;  %v382_v0 = vld [vmem:[#allocation7 + $0x38] sm:$0xff]  ;;  %v381_v2 = vld [vmem:[#allocation7 + $0x30] sm:$0xff]  ;;  %v510_v22 = vmov 0   ;;  %vm283_vm4 = vcmask 64512  }
   0xe   :  { %v390_v1 = vld [vmem:[#allocation7 + $0x78] sm:$0xff]  ;;  %198 = vmatpush.bf16.msra.mxu0 %v382_v0  ;;  %v389_v3 = vld [vmem:[#allocation7 + $0x70] sm:$0xff]  ;;  %v380_v4 = vld [vmem:[#allocation7 + $0x28] sm:$0xff]  ;;  %398 = vset.pattern.permute.xlu1 %v510_v22  ;;  %v272_v0 = vlaneseq  ;;  %s300_s13 = sshll.u32 %s565_s5, 4  ;;  %vm291_vm5 = vcmask 57344   ;;  %s301_s13 = int_to_ptr.hbm [resolvable:$true] %s300_s13 }
   0xf   :  { %212 = vmatpush.bf16.msra.mxu1 %v390_v1  ;;  %v388_v5 = vld [vmem:[#allocation7 + $0x68] sm:$0xff]  ;;  %v379_v6 = vld [vmem:[#allocation7 + $0x20] sm:$0xff]  ;;  %v378_v8 = vld [vmem:[#allocation7 + $0x18] sm:$0xff]  ;;  %399 = vset.pattern.permute.xlu2 %v510_v22 }
  0x10   :  { %v387_v7 = vld [vmem:[#allocation7 + $0x60] sm:$0xff]  ;;  %v386_v9 = vld [vmem:[#allocation7 + $0x58] sm:$0xff]  ;;  %v377_v10 = vld [vmem:[#allocation7 + $0x10] sm:$0xff]  ;;  %400 = vset.pattern.permute.xlu0 %v510_v22  ;;  %v273_v1 = vshrl.u32 %v272_v0, 7 }
  0x11   :  { %v385_v11 = vld [vmem:[#allocation7 + $0x50] sm:$0xff]  ;;  %v376_v12 = vld [vmem:[#allocation7 + $0x8] sm:$0xff]  ;;  %v375_v14 = vld [vmem:[#allocation7] sm:$0xff] }
  0x12   :  { %199 = vmatpush.bf16.msra.mxu0 %v381_v2  ;;  %v384_v13 = vld [vmem:[#allocation7 + $0x48] sm:$0xff]  ;;  %v383_v15 = vld [vmem:[#allocation7 + $0x40] sm:$0xff]  ;;  %v66_v17 = vld [vmem:[#allocation5] sm:$0xff]  ;;  %v275_v2 = vand.u32 127, %v272_v0 }
  0x13   :  { %213 = vmatpush.bf16.msra.mxu1 %v389_v3  ;;  %v64_v16 = vld [vmem:[#allocation2] sm:$0xff]  ;;  %v65_v18 = vld [vmem:[#allocation2 + $0x8] sm:$0xff]  ;;  %v67_v19 = vld [vmem:[#allocation5 + $0x8] sm:$0xff] }
  0x14   :  { %v68_v20 = vpack.c.bf16 %v66_v17, %v64_v16  ;;  %v69_v21 = vpack.c.bf16 %v67_v19, %v65_v18  ;;  %v226_v23 = vld [vmem:[%s564_s4] sm:$0x3f]  ;;  %vm276_vm3 = vcmp.eq.s32.totalorder %v273_v1, %v275_v2 }
  0x15   :  { %v227_v24 = vperm.slane %v226_v23, 0  ;;  %v252_v36 = vld [vmem:[%s560_s0] sm:$0xff]  ;;  %v260_v48 = vperm.slane %v226_v23, 2  ;;  %v258_v49 = vperm.slane %v226_v23, 1  ;;  %v263_v55 = vperm.slane %v226_v23, 3  ;;  %s511_s0 = smov [#allocation8]  }
  0x16   :  { %200 = vmatpush.bf16.msra.mxu0 %v380_v4  ;;  %v266_v58 = vperm.slane %v226_v23, 4  ;;  %v270_v61 = vperm.slane %v226_v23, 5  ;;  %s298_s4 = sshll.u32 %s511_s0, 4  ;;  %s299_s4 = int_to_ptr.vmem [resolvable:$true] %s298_s4 }
  0x17   :  { %214 = vmatpush.bf16.msra.mxu1 %v388_v5 }
  0x1a   :  { %201 = vmatpush.bf16.msra.mxu0 %v379_v6 }
  0x1b   :  { %215 = vmatpush.bf16.msra.mxu1 %v387_v7 }
  0x1e   :  { %202 = vmatpush.bf16.msra.mxu0 %v378_v8 }
  0x1f   :  { %216 = vmatpush.bf16.msra.mxu1 %v386_v9 }
  0x22   :  { %203 = vmatpush.bf16.msra.mxu0 %v377_v10 }
  0x23   :  { %217 = vmatpush.bf16.msra.mxu1 %v385_v11 }
  0x26   :  { %204 = vmatpush.bf16.msra.mxu0 %v376_v12 }
  0x27   :  { %218 = vmatpush.bf16.msra.mxu1 %v384_v13 }
  0x2a   :  { %205 = vmatpush.bf16.msra.mxu0 %v375_v14 }
  0x2b   :  { %219 = vmatpush.bf16.msra.mxu1 %v383_v15 }
  0x2d   :  { %206 = vmatmul.bf16.vlgmr.msra.gmra.mxu0 %v68_v20 }
  0x2e   :  { %220 = vmatmul.bf16.vlgmr.msra.gmra.mxu1 %v69_v21 }
  0xaa   :  { %v207_v25 = vpop.f32.mrf.mxu0 }
  0xab   :  { %v221_v26 = vpop.f32.mrf.mxu1 }
  0xac   :  { %v222_v27 = vadd.f32 %v221_v26, %v207_v25 }
  0xae   :  { %v228_v28 = vadd.f32 %v227_v24, %v222_v27 }
  0xb0   :  { %v233_v29 = vmul.f32 %v228_v28, %v228_v28 }
  0xb2   :  { %234 = vadd.xlane.f32.xlu0 %v233_v29  ;;  %v209_v30 = vpop.f32.mrf.mxu0 }
  0xb3   :  { %v223_v31 = vpop.f32.mrf.mxu1 }
  0xb4   :  { %v224_v32 = vadd.f32 %v223_v31, %v209_v30 }
  0xb6   :  { %v229_v33 = vadd.f32 %v227_v24, %v224_v32 }
  0xb8   :  { %v236_v34 = vmul.f32 %v229_v33, %v229_v33  ;;  %v230_v35 = vmul.f32 %v229_v33, %v228_v28 }
  0xba   :  { %237 = vadd.xlane.f32.xlu0 %v236_v34  ;;  %231 = vadd.xlane.f32.xlu1 %v230_v35 }
  0xd3   :  { %255 = vperm.xlu1 %398, %v252_v36  }
 0x125   :  { %v235_v37 = vpop.xlane.xlu0 %234 }
 0x12d   :  { %v238_v38 = vpop.xlane.xlu0 %237  ;;  %v232_v45 = vpop.xlane.xlu1 %231 }
 0x12e   :  { %v239_v39 = vmul.f32 %v238_v38, %v235_v37 }
 0x130   :  { %v240_v40 = vmax.f32 %v239_v39, 1e-16 }
 0x132   :  { %401 = vrsqrt.f32 %v240_v40  ;;  %vm247_vm1 = vweird.f32 %v240_v40 }
 0x138   :  { %v402_v41 = vpop.eup %401 }
 0x139   :  { %v242_v42 = vmul.f32 %v402_v41, %v240_v40  ;;  %vm248_vm0 = vweird.f32 %v402_v41 }
 0x13a   :  { %vm249_vm2 = vmor %vm247_vm1, %vm248_vm0 }
 0x13b   :  { %v243_v43 = vmul.f32 %v402_v41, %v242_v42 }
 0x13d   :  { %v244_v44 = vmul.f32 0.5, %v243_v43 }
 0x13f   :  { %v245_v46 = vsub.f32 1.5, %v244_v44 }
 0x141   :  { %v246_v47 = vmul.f32 %v402_v41, %v245_v46 }
 0x143   :  { %v250_v50 = vsel %vm249_vm2, %v402_v41, %v246_v47 }
 0x144   :  { %v251_v51 = vmul.f32 %v250_v50, %v232_v45 }
 0x145   :  { %v256_v52 = vpop.permute.xlu1 %255 }
 0x146   :  { %v261_v53 = vmul.f32 %v260_v48, %v251_v51  ;;  %v259_v54 = vmul.f32 %v258_v49, %v256_v52 }
 0x148   :  { %v262_v56 = vadd.f32 %v261_v53, %v259_v54 }
 0x14a   :  { %v264_v57 = vadd.f32 %v263_v55, %v262_v56 }
 0x14c   :  { %v265_v59 = vmax.f32 %v264_v57, 0.0 }
 0x14e   :  { %v267_v60 = vmul.f32 %v266_v58, %v265_v59 }
 0x150   :  { %268 = vadd.xlane.f32.xlu2 %v267_v60 }
 0x1c3   :  { %v269_v62 = vpop.xlane.xlu2 %268 }
 0x1c4   :  { %v271_v63 = vadd.f32 %v270_v61, %v269_v62 }
 0x1c6   :  { %279 = vperm.xlu2 %399, %v271_v63  }
 0x220   :  { %v280_v3 = vpop.permute.xlu2 %279 }
 0x221   :  { %v282_v4 = vsel %vm276_vm3, %v280_v3, 0.0 }
 0x222   :  { %v284_v5 = vsel %vm283_vm4, %v282_v4, 0.0 }
 0x223   :  { %v285_v6 = vrot.slane %v284_v5, 4 }
 0x225   :  { %v286_v7 = vadd.f32 %v285_v6, %v284_v5 }
 0x227   :  { %v287_v8 = vrot.slane %v286_v7, 2 }
 0x229   :  { %v288_v9 = vadd.f32 %v287_v8, %v286_v7 }
 0x22b   :  { %v289_v10 = vrot.slane %v288_v9, 1 }
 0x22d   :  { %v290_v11 = vadd.f32 %v289_v10, %v288_v9 }
 0x22f   :  { %292 = vst.msk [vmem:[#allocation8] sm:$0x1] %vm291_vm5, %v290_v11 }
 0x230   :  { %303 = dma.vmem_to_hbm [thread:$0]  %s299_s4, 16, %s301_s13, [#allocation4]  }
 0x231   :  { %503 = dma.done.wait [#allocation4], 16  }
 0x232   :  { %504 = vsyncadd [#allocation4], 4294967280 }
 0x233   :  { %308 = vsyncpa [#allocation3], 1 }
 0x234   :  { %309 = vsyncpa [#allocation6], 1 }
 0x235   :  { %310 = vsyncpa [#allocation4], 1 }

</bundles_post_ra>
